<compile_context>
chip_gen: v5e
topology: v5e:2x2
jax: 0.10.0
libtpu: 0.0.40
codegen_flags: <defaults>
</compile_context>

<pallas_src>
import math

import jax
import jax.numpy as jnp
from jax import lax
from jax.experimental import pallas as pl
from jax.experimental.pallas import tpu as pltpu


_CLIP_LO = 0.0005
_CLIP_HI = 0.9995


def _round_up(n, m):
    return ((n + m - 1) // m) * m


def _l2_normalize_rows(x):
    """torch.nn.functional.normalize(x, dim=1) in f32 (eps = 1e-12)."""
    x = x.astype(jnp.float32)
    sq = jnp.sum(x * x, axis=1, keepdims=True)
    return x * lax.rsqrt(jnp.maximum(sq, jnp.float32(1e-24)))


def _choose_tiles(N, C):
    """Pick (tm, tn) row tiles for bg / fg.

    tn = 256 matches the 256-wide MXU on v6e/v7x (harmless on v5e); tm is as
    large as a ~12 MiB VMEM input budget allows (fits v7x's 32 MiB scoped
    default) but is shrunk so the 'parallel' i axis has >= 2 blocks when
    possible (v7x megacore sharding).
    """
    if N <= 256:
        t = _round_up(max(N, 8), 8)        # single tile; keep sublane multiple
        return t, t
    tn = 256
    tm = 1024
    budget = 12 * 1024 * 1024
    while tm > 256 and (2 * (tm + tn) * C * 4 + 4 * tm * tn * 4) > budget:
        tm //= 2
    while tm > 256 and -(-N // tm) < 2:    # keep n_i >= 2 for v7x's two TCs
        tm //= 2
    return tm, tn


def _make_simmin_kernel(tm, tn):
    assert tm % 8 == 0
    n_row_groups = tm // 8

    def kernel(bg_ref, fg_ref, out_ref, acc_ref):
        j = pl.program_id(1)               # fg row-tile ('arbitrary' reduction)

        @pl.when(j == 0)
        def _():
            acc_ref[...] = jnp.zeros_like(acc_ref)

        # [tm, C] x [tn, C] -> [tm, tn]: transpose folded into the contraction
        # (contract dim 1 of both operands), f32 accumulation on the MXU.
        sim = lax.dot_general(
            bg_ref[...], fg_ref[...],
            dimension_numbers=(((1,), (1,)), ((), ())),
            preferred_element_type=jnp.float32)

        sim = jnp.clip(sim, _CLIP_LO, _CLIP_HI)
        loss = -jnp.log(1.0 - sim)         # (1 - sim) formed in f32

        # Deferred reduction: fold the (tm, tn) tile into the (8, tn) VMEM
        # accumulator with pure vreg-vreg VPU adds (static, 8-aligned slices).
        acc = acc_ref[...]
        for r in range(n_row_groups):
            acc = acc + loss[r * 8:(r + 1) * 8, :]
        acc_ref[...] = acc

        # Single XLU cross-lane/sublane reduce + SMEM store, once per row block.
        @pl.when(j == pl.num_programs(1) - 1)
        def _():
            out_ref[0, 0] = jnp.sum(acc_ref[...])

    return kernel


def sim_min_loss(embedded_bg, embedded_fg, *, use_bf16_matmul=False):
    """SimMinLoss.forward(embedded_bg, embedded_fg), metric='cos', reduction='mean'."""
    assert embedded_bg.ndim == 2 and embedded_bg.shape == embedded_fg.shape
    N, C = embedded_bg.shape

    # Normalize rows once (fused, mem-bound) instead of once per tile.
    bg_n = _l2_normalize_rows(embedded_bg)
    fg_n = _l2_normalize_rows(embedded_fg)
    if use_bf16_matmul:
        # Optional MXU speedup on v6e/v7x; sim is still accumulated in f32 and
        # (1 - sim) is formed from the f32 matmul result inside the kernel.
        bg_n = bg_n.astype(jnp.bfloat16)
        fg_n = fg_n.astype(jnp.bfloat16)

    tm, tn = _choose_tiles(N, C)
    n_pad_m = _round_up(N, tm)
    n_pad_n = _round_up(N, tn)
    if n_pad_m != N:
        bg_n = jnp.pad(bg_n, ((0, n_pad_m - N), (0, 0)))   # exact zero rows
    if n_pad_n != N:
        fg_n = jnp.pad(fg_n, ((0, n_pad_n - N), (0, 0)))   # exact zero rows

    n_i = n_pad_m // tm
    n_j = n_pad_n // tn

    itemsize = 2 if use_bf16_matmul else 4
    vmem_est = 2 * (tm + tn) * C * itemsize * 2 + 6 * tm * tn * 4
    vmem_limit = int(min(max(2 * vmem_est, 32 * 1024 * 1024), 40 * 1024 * 1024))

    # TODO(synk): for very large C the (tile, C) input blocks should also be
    # chunked along C with an extra 'arbitrary' reduction axis.
    partial = pl.pallas_call(
        _make_simmin_kernel(tm, tn),
        out_shape=jax.ShapeDtypeStruct((n_i, 1), jnp.float32),
        grid=(n_i, n_j),
        in_specs=[
            pl.BlockSpec((tm, C), lambda i, j: (i, 0)),   # bg: resident per i
            pl.BlockSpec((tn, C), lambda i, j: (j, 0)),   # fg: streamed over j
        ],
        out_specs=pl.BlockSpec((1, 1), lambda i, j: (i, 0),
                               memory_space=pltpu.MemorySpace.SMEM),
        scratch_shapes=[pltpu.VMEM((8, tn), jnp.float32)],
        compiler_params=pltpu.CompilerParams(
            # i is independent ('parallel', shards across v7x's two TCs);
            # j is the reduction axis and must stay 'arbitrary'.
            dimension_semantics=("parallel", "arbitrary"),
            vmem_limit_bytes=vmem_limit),
    )(bg_n, fg_n)

    total = jnp.sum(partial)

    # Exact padding correction: padded rows are exact zeros -> sim == 0 ->
    # clipped to exactly 0.0005 -> each padded entry contributes -log(1-0.0005).
    pad_count = n_pad_m * n_pad_n - N * N
    if pad_count:
        total = total - jnp.float32(pad_count * (-math.log(1.0 - _CLIP_LO)))

    # Mean over the LOGICAL N^2 via a trace-time constant multiply.
    return total * jnp.float32(1.0 / (N * N))


def _reference(embedded_bg, embedded_fg):
    # Pure-JAX reference for sanity checking.
    def normalize(x):
        n = jnp.sqrt(jnp.sum(x * x, axis=1, keepdims=True))
        return x / jnp.maximum(n, 1e-12)

    sim = normalize(embedded_bg) @ normalize(embedded_fg).T
    sim = jnp.clip(sim, _CLIP_LO, _CLIP_HI)
    return jnp.mean(-jnp.log(1.0 - sim))


if __name__ == "__main__":
    key = jax.random.PRNGKey(0)
    k1, k2, k3, k4, k5, k6 = jax.random.split(key, 6)

    # [N, C] embeddings as in SimMinLoss.forward — small single-tile case.
    N, C = 8, 32
    embedded_bg = jax.random.normal(k1, (N, C), dtype=jnp.float32)
    embedded_fg = jax.random.normal(k2, (N, C), dtype=jnp.float32)
    loss = sim_min_loss(embedded_bg, embedded_fg)
    jax.block_until_ready(loss)
    ref = _reference(embedded_bg, embedded_fg)
    assert jnp.allclose(loss, ref, rtol=1e-4, atol=1e-4), (loss, ref)

    # Padding + exact constant-correction path (200 -> 208, single tile).
    bg2 = jax.random.normal(k3, (200, 64), dtype=jnp.float32)
    fg2 = jax.random.normal(k4, (200, 64), dtype=jnp.float32)
    loss2 = sim_min_loss(bg2, fg2)
    jax.block_until_ready(loss2)
    ref2 = _reference(bg2, fg2)
    assert jnp.allclose(loss2, ref2, rtol=2e-3, atol=2e-3), (loss2, ref2)

    # Multi-tile grid (2 x 2): exercises the resident SMEM partials, the j
    # reduction with the VMEM accumulator, and the padding correction.
    bg3 = jax.random.normal(k5, (300, 64), dtype=jnp.float32)
    fg3 = jax.random.normal(k6, (300, 64), dtype=jnp.float32)
    loss3 = sim_min_loss(bg3, fg3)
    jax.block_until_ready(loss3)
    ref3 = _reference(bg3, fg3)
    assert jnp.allclose(loss3, ref3, rtol=2e-3, atol=2e-3), (loss3, ref3)

    print("KERNEL_OK")
</pallas_src>

<mosaic_0001>
module attributes {stable_mosaic.version = 11 : i64} {
  func.func @kernel(%arg0: i32, %arg1: i32, %arg2: memref<8x32xf32, #tpu.memory_space<vmem>>, %arg3: memref<8x32xf32, #tpu.memory_space<vmem>>, %arg4: memref<1x1xf32, #tpu.memory_space<smem>>, %arg5: memref<8x8xf32, #tpu.memory_space<vmem>>) attributes {dimension_semantics = [#tpu.dimension_semantics<parallel>, #tpu.dimension_semantics<arbitrary>], iteration_bounds = array<i64: 1, 1>, scalar_prefetch = 0 : i64, scratch_operands = 1 : i64, tpu.core_type = #tpu.core_type<tc>, window_params = [{transform_indices = @transform_0, window_bounds = array<i64: 8, 32>}, {transform_indices = @transform_1, window_bounds = array<i64: 8, 32>}, {transform_indices = @transform_2, window_bounds = array<i64: 1, 1>}]} {
    %c0_i32 = arith.constant 0 : i32
    %0 = arith.cmpi eq, %arg1, %c0_i32 : i32
    %1 = arith.extui %0 : i1 to i32
    %c0_i32_0 = arith.constant 0 : i32
    %2 = arith.cmpi ne, %1, %c0_i32_0 : i32
    scf.if %2 {
      %cst_14 = arith.constant 0.000000e+00 : f32
      %21 = vector.broadcast %cst_14 : f32 to vector<8x8xf32>
      %c0_15 = arith.constant 0 : index
      %c0_16 = arith.constant 0 : index
      %22 = vector.load %arg5[%c0_15, %c0_16] : memref<8x8xf32, #tpu.memory_space<vmem>>, vector<8x8xf32>
      tpu.vector_store %arg5[%c0_15, %c0_16], %21 {strides = array<i32>} : memref<8x8xf32, #tpu.memory_space<vmem>>, vector<8x8xf32>,
    } else {
    }
    %c0 = arith.constant 0 : index
    %c0_1 = arith.constant 0 : index
    %3 = vector.load %arg2[%c0, %c0_1] : memref<8x32xf32, #tpu.memory_space<vmem>>, vector<8x32xf32>
    %c0_2 = arith.constant 0 : index
    %c0_3 = arith.constant 0 : index
    %4 = vector.load %arg3[%c0_2, %c0_3] : memref<8x32xf32, #tpu.memory_space<vmem>>, vector<8x32xf32>
    %cst = arith.constant dense<0.000000e+00> : vector<8x8xf32>
    %5 = tpu.matmul %3, %4, %cst {dimension_numbers = #tpu.dot_dimension_numbers<[1], [1], [0], [0], [0, 0, 1, 0], [], []>} : vector<8x32xf32>, vector<8x32xf32>, vector<8x8xf32> -> vector<8x8xf32>
    %cst_4 = arith.constant 5.000000e-04 : f32
    %cst_5 = arith.constant 0.999499976 : f32
    %6 = vector.broadcast %cst_4 : f32 to vector<8x8xf32>
    %7 = arith.maximumf %6, %5 : vector<8x8xf32>
    %8 = vector.broadcast %cst_5 : f32 to vector<8x8xf32>
    %9 = arith.minimumf %8, %7 : vector<8x8xf32>
    %cst_6 = arith.constant 1.000000e+00 : f32
    %10 = vector.broadcast %cst_6 : f32 to vector<8x8xf32>
    %11 = arith.subf %10, %9 : vector<8x8xf32>
    %12 = math.log %11 : vector<8x8xf32>
    %cst_7 = arith.constant 0.000000e+00 : f32
    %13 = vector.broadcast %cst_7 : f32 to vector<8x8xf32>
    %14 = arith.subf %13, %12 : vector<8x8xf32>
    %c0_8 = arith.constant 0 : index
    %c0_9 = arith.constant 0 : index
    %15 = vector.load %arg5[%c0_8, %c0_9] : memref<8x8xf32, #tpu.memory_space<vmem>>, vector<8x8xf32>
    %16 = arith.addf %15, %14 : vector<8x8xf32>
    %c0_10 = arith.constant 0 : index
    %c0_11 = arith.constant 0 : index
    %17 = vector.load %arg5[%c0_10, %c0_11] : memref<8x8xf32, #tpu.memory_space<vmem>>, vector<8x8xf32>
    tpu.vector_store %arg5[%c0_10, %c0_11], %16 {strides = array<i32>} : memref<8x8xf32, #tpu.memory_space<vmem>>, vector<8x8xf32>,
    %c0_i32_12 = arith.constant 0 : i32
    %18 = arith.cmpi eq, %arg1, %c0_i32_12 : i32
    %19 = arith.extui %18 : i1 to i32
    %c0_i32_13 = arith.constant 0 : i32
    %20 = arith.cmpi ne, %19, %c0_i32_13 : i32
    scf.if %20 {
      %c0_14 = arith.constant 0 : index
      %c0_15 = arith.constant 0 : index
      %21 = vector.load %arg5[%c0_14, %c0_15] : memref<8x8xf32, #tpu.memory_space<vmem>>, vector<8x8xf32>
      %22 = vector.shape_cast %21 : vector<8x8xf32> to vector<1x8x8xf32>
      %cst_16 = arith.constant dense<0.000000e+00> : vector<1xf32>
      %23 = vector.multi_reduction <add>, %22, %cst_16 [1, 2] : vector<1x8x8xf32> to vector<1xf32>
      %24 = vector.shape_cast %23 : vector<1xf32> to vector<1x1x1xf32>
      %25 = vector.extract %24[0, 0, 0] : f32 from vector<1x1x1xf32>
      %c0_17 = arith.constant 0 : index
      %c0_18 = arith.constant 0 : index
      %26 = memref.load %arg4[%c0_17, %c0_18] : memref<1x1xf32, #tpu.memory_space<smem>>
      memref.store %25, %arg4[%c0_17, %c0_18] : memref<1x1xf32, #tpu.memory_space<smem>>
    } else {
    }
    return
  }
  func.func @transform_0(%arg0: i32, %arg1: i32) -> (i32, i32) {
    %c0_i32 = arith.constant 0 : i32
    %c0_i32_0 = arith.constant 0 : i32
    return %arg0, %c0_i32 : i32, i32
  }
  func.func @transform_1(%arg0: i32, %arg1: i32) -> (i32, i32) {
    %c0_i32 = arith.constant 0 : i32
    %c0_i32_0 = arith.constant 0 : i32
    return %arg1, %c0_i32 : i32, i32
  }
  func.func @transform_2(%arg0: i32, %arg1: i32) -> (i32, i32) {
    %c0_i32 = arith.constant 0 : i32
    %c0_i32_0 = arith.constant 0 : i32
    return %arg0, %c0_i32 : i32, i32
  }
}

</mosaic_0001>

<bundles_post_ra>
// kernel: tpu_custom_call.1
= control target key start
LH: loop header
LB: loop body
LE: loop exit
PB: predicated region body
PF: predicated region fallthrough
CT: control target
= control target key end

     0   :  { %7 = vsyncpa [#allocation4], 0  ;;  %s222_s0 = inlined_call_operand.hbm [shape: f32[8,32], index: 0, kind: input, shape index: {}]   ;;  %s223_s1 = inlined_call_operand.hbm [shape: f32[8,32], index: 1, kind: input, shape index: {}]   ;;  %s224_s2 = inlined_call_operand.hbm [shape: f32[1,1], index: 2, kind: output, shape index: {}]  }
   0x1   :  { %8 = vsyncpa [#allocation7], 0 }
   0x2   :  { %9 = vsyncpa [#allocation5], 0  ;;  %s15_s11 = sshll.u32 %s222_s0, 4  ;;  %s194_s12 = smov [#allocation3]   ;;  %s16_s11 = int_to_ptr.hbm [resolvable:$true] %s15_s11 }
   0x3   :  { %s17_s13 = sshll.u32 %s194_s12, 4  ;;  %s26_s16 = sshll.u32 %s223_s1, 4  ;;  %s18_s13 = int_to_ptr.vmem [resolvable:$true] %s17_s13  ;;  %s27_s16 = int_to_ptr.hbm [resolvable:$true] %s26_s16 }
   0x4   :  { %20 = dma.hbm_to_vmem [thread:$0]  %s16_s11, 128, %s18_s13, [#allocation4]  }
   0x5   :  { %s195_s17 = smov [#allocation6]  }
   0x6   :  { %s28_s18 = sshll.u32 %s195_s17, 4  ;;  %s29_s18 = int_to_ptr.vmem [resolvable:$true] %s28_s18 }
   0x7   :  { %31 = dma.hbm_to_vmem [thread:$0]  %s27_s16, 128, %s29_s18, [#allocation7]  }
   0x8   :  { %188 = dma.done.wait [#allocation4], 128  }
   0x9   :  { %189 = vsyncadd [#allocation4], 4294967168 }
   0xa   :  { %190 = dma.done.wait [#allocation7], 128  }
   0xb   :  { %191 = vsyncadd [#allocation7], 4294967168  ;;  %vm48_vm0 = vcmask 261120   ;;  %v47_v0 = vld [vmem:[#allocation6] sm:$0xff]  ;;  %v46_v1 = vld [vmem:[#allocation3] sm:$0xff]  ;;  %vm44_vm1 = vcmask 64512  }
   0xc   :  { %118 = vmatpush.xpose.msk.msra.mxu0 %vm48_vm0, %v47_v0  ;;  %v196_v2 = vmov 0.0   ;;  %s106_s19 = sshll.u32 %s224_s2, 4  ;;  %s197_s21 = smov [#allocation8]   ;;  %s107_s19 = int_to_ptr.hbm [resolvable:$true] %s106_s19 }
   0xd   :  { %45 = vst.msk [vmem:[#allocation2] sm:$0xff] %vm44_vm1, %v196_v2 }
   0xf   :  { %119 = vmatmul.msk.f32.vlgmr.msra.gmra.mxu0 %vm48_vm0, %v46_v1 }
  0x14   :  { %v81_v9 = vld [vmem:[#allocation2] sm:$0xff] }
  0x8c   :  { %v72_v3 = vpop.f32.mrf.mxu0 }
  0x8d   :  { %v75_v4 = vmax.f32 %v72_v3, 0.0005 }
  0x8f   :  { %v76_v5 = vmin.f32 %v75_v4, 0.9995 }
  0x91   :  { %v77_v6 = vsub.f32 1.0, %v76_v5 }
  0x93   :  { %126 = vlog2.f32 %v77_v6 }
  0x99   :  { %v127_v7 = vpop.eup %126 }
  0x9a   :  { %v79_v8 = vmul.f32 0.6931472, %v127_v7 }
  0x9c   :  { %v80_v10 = vsub.f32 0.0, %v79_v8 }
  0x9e   :  { %v82_v11 = vadd.f32 %v81_v9, %v80_v10 }
  0xa0   :  { %84 = vst.msk [vmem:[#allocation2] sm:$0xff] %vm44_vm1, %v82_v11 }
  0xa7   :  { %v88_v12 = vld [vmem:[#allocation2] sm:$0xff] }
  0xa8   :  { %v89_v13 = vsel %vm44_vm1, %v88_v12, 0.0 }
  0xa9   :  { %90 = vadd.xlane.f32.xlu0 %v89_v13 }
 0x11c   :  { %v91_v14 = vpop.xlane.xlu0 %90 }
 0x11d   :  { %v92_v15 = vrot.slane %v91_v14, 4 }
 0x11f   :  { %v93_v16 = vadd.f32 %v92_v15, %v91_v14 }
 0x121   :  { %v94_v17 = vrot.slane %v93_v16, 2 }
 0x123   :  { %v95_v18 = vadd.f32 %v94_v17, %v93_v16 }
 0x125   :  { %v96_v19 = vrot.slane %v95_v18, 1 }
 0x127   :  { %v97_v20 = vadd.f32 %v96_v19, %v95_v18 }
 0x129   :  { %120 = vpush %v97_v20 }
 0x15a   :  { %s121_s20 = spop %120 }
 0x15b   :  { %100 = sst [smem:[#allocation8]] %s121_s20 }
 0x15c   :  { %109 = dma.smem_to_hbm %s197_s21, 16, %s107_s19, [#allocation5]  }
 0x15d   :  { %192 = dma.done.wait [#allocation5], 16  }
 0x15e   :  { %193 = vsyncadd [#allocation5], 4294967280 }
 0x15f   :  { %114 = sfence }
 0x160   :  { %115 = vsyncpa [#allocation4], 1 }
 0x161   :  { %116 = vsyncpa [#allocation7], 1 }
 0x162   :  { %117 = vsyncpa [#allocation5], 1 }

</bundles_post_ra>
